<compile_context>
chip_gen: v7x
topology: tpu7x:2x2x1
jax: 0.10.0
libtpu: 0.0.40
codegen_flags: <defaults>
</compile_context>

<pallas_src>
import jax
import jax.numpy as jnp
import numpy as np
from jax.experimental import pallas as pl
from jax.experimental.pallas import tpu as pltpu

# ----- small, module-consistent sizes -----
B, N = 2, 8                  # bags, instances (nodes) per bag
D_IN = 16                    # raw instance features
D_ENC = 32                   # encoder output dim (d_enc)
D_GNN_HID = 32               # ds_gnn_hid = (32,)
D_GNN = 32                   # d_gnn
D_FC_HID = 32                # ds_fc_hid = (32,)
N_CLASSES = 4

LANES = 128                  # lane-dense slab / output width

# parameter-slab row offsets (all multiples of 8 sublanes)
R_ENC = 0                        # w_enc            : (D_IN, D_ENC)
R_W1 = R_ENC + D_IN              # [wr1|wl1|wpr|wpl]: (D_ENC, 66) padded
R_W2 = R_W1 + D_ENC              # [wr2|wl2]        : (D_GNN_HID, 64) padded
R_WC1 = R_W2 + D_GNN_HID         # wc1              : (D_GNN, D_FC_HID) padded
R_WC2 = R_WC1 + D_GNN            # wc2              : (D_FC_HID, N_CLASSES) padded
R_BIAS = R_WC2 + D_FC_HID        # bias block (8 rows)
R_TOTAL = R_BIAS + 8             # 152 rows total

# bias rows inside the bias block
B_ENC_ROW, BL1_ROW, BL2_ROW, BC1_ROW, BC2_ROW, BPL_ROW = 0, 1, 2, 3, 4, 5

# merged output layout
CW_OFF = 8                   # cluster weights live in lanes [CW_OFF, CW_OFF+N)
OUT_ROWS = 8                 # pad rows to a full (8, 128) vreg tile


def _per_bag_reduce(arr, reducer):
    """arr: (B*N, L) -> (B, L); reduce each bag's N rows (static unrolled)."""
    rows = [reducer(arr[b * N:(b + 1) * N, :], axis=0, keepdims=True)
            for b in range(B)]
    return jnp.concatenate(rows, axis=0)


def _bag_expand(rows):
    """rows: (B, L) -> (B*N, L); repeat each bag row for its N nodes."""
    reps = [jnp.broadcast_to(rows[b:b + 1, :], (N, rows.shape[1]))
            for b in range(B)]
    return jnp.concatenate(reps, axis=0)


def cluster_gnn_kernel(x_ref, w_ref, out_ref):
    f32 = jnp.float32
    HID = D_GNN_HID

    x = x_ref[...]                                        # (B*N, D_IN)

    # static, aligned slices of the single parameter slab
    w_enc = w_ref[R_ENC:R_ENC + D_IN, 0:D_ENC]            # (D_IN, D_ENC)
    w1f = w_ref[R_W1:R_W1 + D_ENC, :]                     # (D_ENC, 128)
    w2f = w_ref[R_W2:R_W2 + HID, :]                       # (HID, 128)
    wc1 = w_ref[R_WC1:R_WC1 + D_GNN, :]                   # (D_GNN, 128)
    wc2 = w_ref[R_WC2:R_WC2 + D_FC_HID, :]                # (D_FC_HID, 128)
    bias = w_ref[R_BIAS:R_BIAS + 8, :]                    # (8, 128)

    # --- encoder: Linear + ReLU (all bags at once) ---
    h0 = jnp.maximum(
        jnp.dot(x, w_enc, preferred_element_type=f32)
        + bias[B_ENC_ROW:B_ENC_ROW + 1, 0:D_ENC], 0.0)    # (B*N, D_ENC)

    # --- fused layer-1 + pool matmul: lanes [0,HID)=wr1, [HID,2HID)=wl1,
    #     [2HID]=wpr, [2HID+1]=wpl (rest zero) ---
    f1 = jnp.dot(h0, w1f, preferred_element_type=f32)     # (B*N, 128)
    m1 = _bag_expand(_per_bag_reduce(f1, jnp.mean))       # per-bag node means

    # SAGEConv1 + ReLU:  h0@wr1 + mean0@wl1 + bl1   (mean(h0@W) == mean(h0)@W)
    h1 = jnp.maximum(
        f1[:, 0:HID] + m1[:, HID:2 * HID]
        + bias[BL1_ROW:BL1_ROW + 1, 0:HID], 0.0)          # (B*N, HID)

    # gnn_pool SAGEConv(d_enc -> 1) logits; per-bag constant terms are kept for
    # fidelity (they cancel under the per-bag softmax anyway).
    pool_col = (f1[:, 2 * HID:2 * HID + 1]
                + m1[:, 2 * HID + 1:2 * HID + 2]
                + bias[BPL_ROW:BPL_ROW + 1, 0:1])         # (B*N, 1)
    pool_row = jnp.transpose(pool_col)                    # (1, B*N) tiny XLU relayout
    pool_mat = jnp.concatenate(
        [pool_row[:, b * N:(b + 1) * N] for b in range(B)], axis=0)   # (B, N)
    pool_mat = pool_mat - jnp.max(pool_mat, axis=1, keepdims=True)
    e = jnp.exp(pool_mat)
    cw_mat = e / jnp.sum(e, axis=1, keepdims=True)        # (B, N) cluster weights

    # --- fused layer-2 matmul: lanes [0,D_GNN)=wr2, [D_GNN,2*D_GNN)=wl2 ---
    f2 = jnp.dot(h1, w2f, preferred_element_type=f32)     # (B*N, 128)
    m2 = _bag_expand(_per_bag_reduce(f2, jnp.mean))
    h2 = jnp.maximum(
        f2[:, 0:D_GNN] + m2[:, D_GNN:2 * D_GNN]
        + bias[BL2_ROW:BL2_ROW + 1, 0:D_GNN], 0.0)        # (B*N, D_GNN)

    # --- dense_diff_pool with a single cluster => per-bag sum over nodes ---
    g = _per_bag_reduce(h2, jnp.sum)                      # (B, D_GNN)

    # --- classifier: Linear -> ReLU -> Linear (lane-padded weight slabs keep
    #     outputs lane-dense with zeros outside the valid lanes) ---
    z = jnp.maximum(
        jnp.dot(g, wc1, preferred_element_type=f32)
        + bias[BC1_ROW:BC1_ROW + 1, :], 0.0)              # (B, 128)
    pred = (jnp.dot(z[:, 0:D_FC_HID], wc2, preferred_element_type=f32)
            + bias[BC2_ROW:BC2_ROW + 1, :])               # (B, 128); lanes [0,C)

    # --- single merged lane-dense store: pred in [0,C), cw in [CW_OFF,CW_OFF+N) ---
    cw_block = jnp.concatenate(
        [jnp.zeros((B, CW_OFF), f32), cw_mat,
         jnp.zeros((B, LANES - CW_OFF - N), f32)], axis=1)            # (B, 128)
    rows = pred + cw_block                                            # (B, 128)
    out_ref[...] = jnp.concatenate(
        [rows, jnp.zeros((OUT_ROWS - B, LANES), f32)], axis=0)        # (8, 128)


def pack_params(params):
    """Concatenate all 15 parameters into one lane-dense (R_TOTAL, 128) slab."""
    (w_enc, b_enc, wl1, bl1, wr1, wl2, bl2, wr2,
     wpl, bpl, wpr, wc1, bc1, wc2, bc2) = params

    def pad_lanes(a):
        return jnp.pad(a, ((0, 0), (0, LANES - a.shape[1])))

    w1f = jnp.concatenate([wr1, wl1, wpr, wpl], axis=1)   # (D_ENC, 66)
    w2f = jnp.concatenate([wr2, wl2], axis=1)             # (HID, 64)

    bias = jnp.zeros((8, LANES), jnp.float32)
    bias = bias.at[B_ENC_ROW, :D_ENC].set(b_enc[0])
    bias = bias.at[BL1_ROW, :D_GNN_HID].set(bl1[0])
    bias = bias.at[BL2_ROW, :D_GNN].set(bl2[0])
    bias = bias.at[BC1_ROW, :D_FC_HID].set(bc1[0])
    bias = bias.at[BC2_ROW, :N_CLASSES].set(bc2[0])
    bias = bias.at[BPL_ROW, 0].set(bpl[0, 0])

    slab = jnp.concatenate([
        pad_lanes(w_enc),     # rows [R_ENC,  R_W1)
        pad_lanes(w1f),       # rows [R_W1,   R_W2)
        pad_lanes(w2f),       # rows [R_W2,   R_WC1)
        pad_lanes(wc1),       # rows [R_WC1,  R_WC2)
        pad_lanes(wc2),       # rows [R_WC2,  R_BIAS)
        bias,                 # rows [R_BIAS, R_TOTAL)
    ], axis=0)
    assert slab.shape == (R_TOTAL, LANES)
    return slab


def cluster_gnn_forward(x, params):
    """x: (B, N, D_IN) float32. Returns (bag_predictions (B, C),
    bag_cluster_weights (B, 1, N))."""
    slab = pack_params(params)
    x2d = x.reshape(B * N, D_IN)

    out = pl.pallas_call(
        cluster_gnn_kernel,
        out_shape=jax.ShapeDtypeStruct((OUT_ROWS, LANES), jnp.float32),
        grid=(1,),
        in_specs=[
            pl.BlockSpec((B * N, D_IN), lambda i: (0, 0)),
            pl.BlockSpec((R_TOTAL, LANES), lambda i: (0, 0)),
        ],
        out_specs=pl.BlockSpec((OUT_ROWS, LANES), lambda i: (0, 0)),
        compiler_params=pltpu.CompilerParams(
            dimension_semantics=("arbitrary",)),
        cost_estimate=pl.CostEstimate(
            flops=320_000, transcendentals=B * N, bytes_accessed=96_000),
    )(x2d, slab)

    preds = out[:B, :N_CLASSES]                           # (B, C)
    cw = out[:B, CW_OFF:CW_OFF + N].reshape(B, 1, N)      # (B, 1, N)
    return preds, cw


def reference_forward(x, params):
    (w_enc, b_enc, wl1, bl1, wr1, wl2, bl2, wr2,
     wpl, bpl, wpr, wc1, bc1, wc2, bc2) = params
    preds, cws = [], []
    for b in range(B):
        xb = x[b]
        h0 = jnp.maximum(xb @ w_enc + b_enc, 0.0)
        m0 = jnp.mean(h0, axis=0, keepdims=True)
        h1 = jnp.maximum(m0 @ wl1 + bl1 + h0 @ wr1, 0.0)
        m1 = jnp.mean(h1, axis=0, keepdims=True)
        h2 = jnp.maximum(m1 @ wl2 + bl2 + h1 @ wr2, 0.0)
        pool = m0 @ wpl + bpl + h0 @ wpr
        cw = jax.nn.softmax(pool, axis=0)
        g = jnp.sum(h2, axis=0, keepdims=True)
        z = jnp.maximum(g @ wc1 + bc1, 0.0)
        preds.append((z @ wc2 + bc2)[0])
        cws.append(cw.T)
    return jnp.stack(preds), jnp.stack(cws)


def init_params(key):
    ks = jax.random.split(key, 16)
    s = 0.1
    w_enc = s * jax.random.normal(ks[0], (D_IN, D_ENC), jnp.float32)
    b_enc = s * jax.random.normal(ks[1], (1, D_ENC), jnp.float32)
    # SAGEConv 1 (d_enc -> hid): lin_l (bias) on aggregated mean, lin_r (no bias)
    wl1 = s * jax.random.normal(ks[2], (D_ENC, D_GNN_HID), jnp.float32)
    bl1 = s * jax.random.normal(ks[3], (1, D_GNN_HID), jnp.float32)
    wr1 = s * jax.random.normal(ks[4], (D_ENC, D_GNN_HID), jnp.float32)
    # SAGEConv 2 (hid -> d_gnn)
    wl2 = s * jax.random.normal(ks[5], (D_GNN_HID, D_GNN), jnp.float32)
    bl2 = s * jax.random.normal(ks[6], (1, D_GNN), jnp.float32)
    wr2 = s * jax.random.normal(ks[7], (D_GNN_HID, D_GNN), jnp.float32)
    # gnn_pool SAGEConv (d_enc -> 1 cluster)
    wpl = s * jax.random.normal(ks[8], (D_ENC, 1), jnp.float32)
    bpl = s * jax.random.normal(ks[9], (1, 1), jnp.float32)
    wpr = s * jax.random.normal(ks[10], (D_ENC, 1), jnp.float32)
    # classifier FullyConnectedStack (d_gnn -> fc_hid -> n_classes), raw_last
    wc1 = s * jax.random.normal(ks[11], (D_GNN, D_FC_HID), jnp.float32)
    bc1 = s * jax.random.normal(ks[12], (1, D_FC_HID), jnp.float32)
    wc2 = s * jax.random.normal(ks[13], (D_FC_HID, N_CLASSES), jnp.float32)
    bc2 = s * jax.random.normal(ks[14], (1, N_CLASSES), jnp.float32)
    return (w_enc, b_enc, wl1, bl1, wr1, wl2, bl2, wr2,
            wpl, bpl, wpr, wc1, bc1, wc2, bc2)


if __name__ == "__main__":
    key = jax.random.PRNGKey(0)
    kx, kp = jax.random.split(key)
    x = jax.random.normal(kx, (B, N, D_IN), jnp.float32)
    params = init_params(kp)

    preds, cw = cluster_gnn_forward(x, params)
    preds = jax.block_until_ready(preds)
    cw = jax.block_until_ready(cw)

    ref_preds, ref_cw = reference_forward(x, params)
    np.testing.assert_allclose(np.asarray(preds), np.asarray(ref_preds),
                               rtol=1e-5, atol=1e-5)
    np.testing.assert_allclose(np.asarray(cw), np.asarray(ref_cw),
                               rtol=1e-5, atol=1e-5)
    print("KERNEL_OK")
</pallas_src>

<mosaic_0001>
module attributes {stable_mosaic.version = 11 : i64} {
  func.func @cluster_gnn_kernel(%arg0: i32, %arg1: memref<16x16xf32, #tpu.memory_space<vmem>>, %arg2: memref<152x128xf32, #tpu.memory_space<vmem>>, %arg3: memref<8x128xf32, #tpu.memory_space<vmem>>) attributes {dimension_semantics = [#tpu.dimension_semantics<arbitrary>], iteration_bounds = array<i64: 1>, scalar_prefetch = 0 : i64, scratch_operands = 0 : i64, tpu.core_type = #tpu.core_type<tc>, window_params = [{pipeline_mode = #tpu.pipeline_mode<synchronous>, transform_indices = @transform_0, window_bounds = array<i64: 16, 16>}, {pipeline_mode = #tpu.pipeline_mode<synchronous>, transform_indices = @transform_1, window_bounds = array<i64: 152, 128>}, {pipeline_mode = #tpu.pipeline_mode<synchronous>, transform_indices = @transform_2, window_bounds = array<i64: 8, 128>}]} {
    %c0 = arith.constant 0 : index
    %c0_0 = arith.constant 0 : index
    %0 = vector.load %arg1[%c0, %c0_0] : memref<16x16xf32, #tpu.memory_space<vmem>>, vector<16x16xf32>
    %c0_1 = arith.constant 0 : index
    %c0_2 = arith.constant 0 : index
    %1 = vector.load %arg2[%c0_1, %c0_2] : memref<152x128xf32, #tpu.memory_space<vmem>>, vector<16x32xf32>
    %c16 = arith.constant 16 : index
    %c0_3 = arith.constant 0 : index
    %2 = vector.load %arg2[%c16, %c0_3] : memref<152x128xf32, #tpu.memory_space<vmem>>, vector<32x128xf32>
    %c48 = arith.constant 48 : index
    %c0_4 = arith.constant 0 : index
    %3 = vector.load %arg2[%c48, %c0_4] : memref<152x128xf32, #tpu.memory_space<vmem>>, vector<32x128xf32>
    %c80 = arith.constant 80 : index
    %c0_5 = arith.constant 0 : index
    %4 = vector.load %arg2[%c80, %c0_5] : memref<152x128xf32, #tpu.memory_space<vmem>>, vector<32x128xf32>
    %c112 = arith.constant 112 : index
    %c0_6 = arith.constant 0 : index
    %5 = vector.load %arg2[%c112, %c0_6] : memref<152x128xf32, #tpu.memory_space<vmem>>, vector<32x128xf32>
    %c144 = arith.constant 144 : index
    %c0_7 = arith.constant 0 : index
    %6 = vector.load %arg2[%c144, %c0_7] : memref<152x128xf32, #tpu.memory_space<vmem>>, vector<8x128xf32>
    %cst = arith.constant dense<0.000000e+00> : vector<16x32xf32>
    %7 = tpu.matmul %0, %1, %cst {dimension_numbers = #tpu.dot_dimension_numbers<[1], [0], [0], [1], [0, 0, 1, 1], [], []>} : vector<16x16xf32>, vector<16x32xf32>, vector<16x32xf32> -> vector<16x32xf32>
    %8 = vector.extract_strided_slice %6 {offsets = [0, 0], sizes = [1, 32], strides = [1, 1]} : vector<8x128xf32> to vector<1x32xf32>
    %9 = vector.broadcast %8 : vector<1x32xf32> to vector<16x32xf32>
    %10 = arith.addf %7, %9 : vector<16x32xf32>
    %cst_8 = arith.constant 0.000000e+00 : f32
    %11 = vector.broadcast %cst_8 : f32 to vector<16x32xf32>
    %12 = arith.maximumf %10, %11 : vector<16x32xf32>
    %cst_9 = arith.constant dense<0.000000e+00> : vector<16x128xf32>
    %13 = tpu.matmul %12, %2, %cst_9 {dimension_numbers = #tpu.dot_dimension_numbers<[1], [0], [0], [1], [0, 0, 1, 1], [], []>} : vector<16x32xf32>, vector<32x128xf32>, vector<16x128xf32> -> vector<16x128xf32>
    %14 = vector.extract_strided_slice %13 {offsets = [0, 0], sizes = [8, 128], strides = [1, 1]} : vector<16x128xf32> to vector<8x128xf32>
    %cst_10 = arith.constant dense<0.000000e+00> : vector<128xf32>
    %15 = vector.multi_reduction <add>, %14, %cst_10 [0] : vector<8x128xf32> to vector<128xf32>
    %16 = vector.shape_cast %15 : vector<128xf32> to vector<1x128xf32>
    %cst_11 = arith.constant 8.000000e+00 : f32
    %17 = vector.broadcast %cst_11 : f32 to vector<1x128xf32>
    %18 = arith.divf %16, %17 : vector<1x128xf32>
    %19 = vector.extract_strided_slice %13 {offsets = [8, 0], sizes = [8, 128], strides = [1, 1]} : vector<16x128xf32> to vector<8x128xf32>
    %cst_12 = arith.constant dense<0.000000e+00> : vector<128xf32>
    %20 = vector.multi_reduction <add>, %19, %cst_12 [0] : vector<8x128xf32> to vector<128xf32>
    %21 = vector.shape_cast %20 : vector<128xf32> to vector<1x128xf32>
    %cst_13 = arith.constant 8.000000e+00 : f32
    %22 = vector.broadcast %cst_13 : f32 to vector<1x128xf32>
    %23 = arith.divf %21, %22 : vector<1x128xf32>
    %24 = tpu.concatenate %18, %23 in 0 : vector<1x128xf32>, vector<1x128xf32> -> vector<2x128xf32>
    %25 = vector.extract_strided_slice %24 {offsets = [0, 0], sizes = [1, 128], strides = [1, 1]} : vector<2x128xf32> to vector<1x128xf32>
    %26 = vector.shape_cast %25 : vector<1x128xf32> to vector<1x128xf32>
    %27 = vector.broadcast %26 : vector<1x128xf32> to vector<8x128xf32>
    %28 = vector.extract_strided_slice %24 {offsets = [1, 0], sizes = [1, 128], strides = [1, 1]} : vector<2x128xf32> to vector<1x128xf32>
    %29 = vector.shape_cast %28 : vector<1x128xf32> to vector<1x128xf32>
    %30 = vector.broadcast %29 : vector<1x128xf32> to vector<8x128xf32>
    %31 = tpu.concatenate %27, %30 in 0 : vector<8x128xf32>, vector<8x128xf32> -> vector<16x128xf32>
    %32 = vector.extract_strided_slice %13 {offsets = [0, 0], sizes = [16, 32], strides = [1, 1]} : vector<16x128xf32> to vector<16x32xf32>
    %33 = vector.extract_strided_slice %31 {offsets = [0, 32], sizes = [16, 32], strides = [1, 1]} : vector<16x128xf32> to vector<16x32xf32>
    %34 = arith.addf %32, %33 : vector<16x32xf32>
    %35 = vector.extract_strided_slice %6 {offsets = [1, 0], sizes = [1, 32], strides = [1, 1]} : vector<8x128xf32> to vector<1x32xf32>
    %36 = vector.broadcast %35 : vector<1x32xf32> to vector<16x32xf32>
    %37 = arith.addf %34, %36 : vector<16x32xf32>
    %cst_14 = arith.constant 0.000000e+00 : f32
    %38 = vector.broadcast %cst_14 : f32 to vector<16x32xf32>
    %39 = arith.maximumf %37, %38 : vector<16x32xf32>
    %40 = vector.extract_strided_slice %13 {offsets = [0, 64], sizes = [16, 1], strides = [1, 1]} : vector<16x128xf32> to vector<16x1xf32>
    %41 = vector.extract_strided_slice %31 {offsets = [0, 65], sizes = [16, 1], strides = [1, 1]} : vector<16x128xf32> to vector<16x1xf32>
    %42 = arith.addf %40, %41 : vector<16x1xf32>
    %43 = vector.extract_strided_slice %6 {offsets = [5, 0], sizes = [1, 1], strides = [1, 1]} : vector<8x128xf32> to vector<1x1xf32>
    %44 = vector.broadcast %43 : vector<1x1xf32> to vector<16x1xf32>
    %45 = arith.addf %42, %44 : vector<16x1xf32>
    %46 = tpu.transpose %45, [1, 0] : vector<16x1xf32> -> vector<1x16xf32>
    %47 = vector.extract_strided_slice %46 {offsets = [0, 0], sizes = [1, 8], strides = [1, 1]} : vector<1x16xf32> to vector<1x8xf32>
    %48 = vector.extract_strided_slice %46 {offsets = [0, 8], sizes = [1, 8], strides = [1, 1]} : vector<1x16xf32> to vector<1x8xf32>
    %49 = tpu.concatenate %47, %48 in 0 : vector<1x8xf32>, vector<1x8xf32> -> vector<2x8xf32>
    %cst_15 = arith.constant dense<0xFF800000> : vector<2xf32>
    %50 = vector.multi_reduction <maximumf>, %49, %cst_15 [1] : vector<2x8xf32> to vector<2xf32>
    %51 = vector.shape_cast %50 : vector<2xf32> to vector<2x1xf32>
    %52 = vector.broadcast %51 : vector<2x1xf32> to vector<2x8xf32>
    %53 = arith.subf %49, %52 : vector<2x8xf32>
    %54 = math.exp %53 : vector<2x8xf32>
    %cst_16 = arith.constant dense<0.000000e+00> : vector<2xf32>
    %55 = vector.multi_reduction <add>, %54, %cst_16 [1] : vector<2x8xf32> to vector<2xf32>
    %56 = vector.shape_cast %55 : vector<2xf32> to vector<2x1xf32>
    %57 = vector.broadcast %56 : vector<2x1xf32> to vector<2x8xf32>
    %58 = arith.divf %54, %57 : vector<2x8xf32>
    %cst_17 = arith.constant dense<0.000000e+00> : vector<16x128xf32>
    %59 = tpu.matmul %39, %3, %cst_17 {dimension_numbers = #tpu.dot_dimension_numbers<[1], [0], [0], [1], [0, 0, 1, 1], [], []>} : vector<16x32xf32>, vector<32x128xf32>, vector<16x128xf32> -> vector<16x128xf32>
    %60 = vector.extract_strided_slice %59 {offsets = [0, 0], sizes = [8, 128], strides = [1, 1]} : vector<16x128xf32> to vector<8x128xf32>
    %cst_18 = arith.constant dense<0.000000e+00> : vector<128xf32>
    %61 = vector.multi_reduction <add>, %60, %cst_18 [0] : vector<8x128xf32> to vector<128xf32>
    %62 = vector.shape_cast %61 : vector<128xf32> to vector<1x128xf32>
    %cst_19 = arith.constant 8.000000e+00 : f32
    %63 = vector.broadcast %cst_19 : f32 to vector<1x128xf32>
    %64 = arith.divf %62, %63 : vector<1x128xf32>
    %65 = vector.extract_strided_slice %59 {offsets = [8, 0], sizes = [8, 128], strides = [1, 1]} : vector<16x128xf32> to vector<8x128xf32>
    %cst_20 = arith.constant dense<0.000000e+00> : vector<128xf32>
    %66 = vector.multi_reduction <add>, %65, %cst_20 [0] : vector<8x128xf32> to vector<128xf32>
    %67 = vector.shape_cast %66 : vector<128xf32> to vector<1x128xf32>
    %cst_21 = arith.constant 8.000000e+00 : f32
    %68 = vector.broadcast %cst_21 : f32 to vector<1x128xf32>
    %69 = arith.divf %67, %68 : vector<1x128xf32>
    %70 = tpu.concatenate %64, %69 in 0 : vector<1x128xf32>, vector<1x128xf32> -> vector<2x128xf32>
    %71 = vector.extract_strided_slice %70 {offsets = [0, 0], sizes = [1, 128], strides = [1, 1]} : vector<2x128xf32> to vector<1x128xf32>
    %72 = vector.shape_cast %71 : vector<1x128xf32> to vector<1x128xf32>
    %73 = vector.broadcast %72 : vector<1x128xf32> to vector<8x128xf32>
    %74 = vector.extract_strided_slice %70 {offsets = [1, 0], sizes = [1, 128], strides = [1, 1]} : vector<2x128xf32> to vector<1x128xf32>
    %75 = vector.shape_cast %74 : vector<1x128xf32> to vector<1x128xf32>
    %76 = vector.broadcast %75 : vector<1x128xf32> to vector<8x128xf32>
    %77 = tpu.concatenate %73, %76 in 0 : vector<8x128xf32>, vector<8x128xf32> -> vector<16x128xf32>
    %78 = vector.extract_strided_slice %59 {offsets = [0, 0], sizes = [16, 32], strides = [1, 1]} : vector<16x128xf32> to vector<16x32xf32>
    %79 = vector.extract_strided_slice %77 {offsets = [0, 32], sizes = [16, 32], strides = [1, 1]} : vector<16x128xf32> to vector<16x32xf32>
    %80 = arith.addf %78, %79 : vector<16x32xf32>
    %81 = vector.extract_strided_slice %6 {offsets = [2, 0], sizes = [1, 32], strides = [1, 1]} : vector<8x128xf32> to vector<1x32xf32>
    %82 = vector.broadcast %81 : vector<1x32xf32> to vector<16x32xf32>
    %83 = arith.addf %80, %82 : vector<16x32xf32>
    %cst_22 = arith.constant 0.000000e+00 : f32
    %84 = vector.broadcast %cst_22 : f32 to vector<16x32xf32>
    %85 = arith.maximumf %83, %84 : vector<16x32xf32>
    %86 = vector.extract_strided_slice %85 {offsets = [0, 0], sizes = [8, 32], strides = [1, 1]} : vector<16x32xf32> to vector<8x32xf32>
    %cst_23 = arith.constant dense<0.000000e+00> : vector<32xf32>
    %87 = vector.multi_reduction <add>, %86, %cst_23 [0] : vector<8x32xf32> to vector<32xf32>
    %88 = vector.shape_cast %87 : vector<32xf32> to vector<1x32xf32>
    %89 = vector.extract_strided_slice %85 {offsets = [8, 0], sizes = [8, 32], strides = [1, 1]} : vector<16x32xf32> to vector<8x32xf32>
    %cst_24 = arith.constant dense<0.000000e+00> : vector<32xf32>
    %90 = vector.multi_reduction <add>, %89, %cst_24 [0] : vector<8x32xf32> to vector<32xf32>
    %91 = vector.shape_cast %90 : vector<32xf32> to vector<1x32xf32>
    %92 = tpu.concatenate %88, %91 in 0 : vector<1x32xf32>, vector<1x32xf32> -> vector<2x32xf32>
    %cst_25 = arith.constant dense<0.000000e+00> : vector<2x128xf32>
    %93 = tpu.matmul %92, %4, %cst_25 {dimension_numbers = #tpu.dot_dimension_numbers<[1], [0], [0], [1], [0, 0, 1, 1], [], []>} : vector<2x32xf32>, vector<32x128xf32>, vector<2x128xf32> -> vector<2x128xf32>
    %94 = vector.extract_strided_slice %6 {offsets = [3, 0], sizes = [1, 128], strides = [1, 1]} : vector<8x128xf32> to vector<1x128xf32>
    %95 = vector.broadcast %94 : vector<1x128xf32> to vector<2x128xf32>
    %96 = arith.addf %93, %95 : vector<2x128xf32>
    %cst_26 = arith.constant 0.000000e+00 : f32
    %97 = vector.broadcast %cst_26 : f32 to vector<2x128xf32>
    %98 = arith.maximumf %96, %97 : vector<2x128xf32>
    %99 = vector.extract_strided_slice %98 {offsets = [0, 0], sizes = [2, 32], strides = [1, 1]} : vector<2x128xf32> to vector<2x32xf32>
    %cst_27 = arith.constant dense<0.000000e+00> : vector<2x128xf32>
    %100 = tpu.matmul %99, %5, %cst_27 {dimension_numbers = #tpu.dot_dimension_numbers<[1], [0], [0], [1], [0, 0, 1, 1], [], []>} : vector<2x32xf32>, vector<32x128xf32>, vector<2x128xf32> -> vector<2x128xf32>
    %101 = vector.extract_strided_slice %6 {offsets = [4, 0], sizes = [1, 128], strides = [1, 1]} : vector<8x128xf32> to vector<1x128xf32>
    %102 = vector.broadcast %101 : vector<1x128xf32> to vector<2x128xf32>
    %103 = arith.addf %100, %102 : vector<2x128xf32>
    %cst_28 = arith.constant 0.000000e+00 : f32
    %104 = vector.broadcast %cst_28 : f32 to vector<2x8xf32>
    %cst_29 = arith.constant 0.000000e+00 : f32
    %105 = vector.broadcast %cst_29 : f32 to vector<2x112xf32>
    %106 = tpu.concatenate %104, %58, %105 in 1 : vector<2x8xf32>, vector<2x8xf32>, vector<2x112xf32> -> vector<2x128xf32>
    %107 = arith.addf %103, %106 : vector<2x128xf32>
    %cst_30 = arith.constant 0.000000e+00 : f32
    %108 = vector.broadcast %cst_30 : f32 to vector<6x128xf32>
    %109 = tpu.concatenate %107, %108 in 0 : vector<2x128xf32>, vector<6x128xf32> -> vector<8x128xf32>
    %c0_31 = arith.constant 0 : index
    %c0_32 = arith.constant 0 : index
    %110 = vector.load %arg3[%c0_31, %c0_32] : memref<8x128xf32, #tpu.memory_space<vmem>>, vector<8x128xf32>
    tpu.vector_store %arg3[%c0_31, %c0_32], %109 {strides = array<i32>} : memref<8x128xf32, #tpu.memory_space<vmem>>, vector<8x128xf32>,
    return
  }
  func.func @transform_0(%arg0: i32) -> (i32, i32) {
    %c0_i32 = arith.constant 0 : i32
    %c0_i32_0 = arith.constant 0 : i32
    %c0_i32_1 = arith.constant 0 : i32
    return %c0_i32, %c0_i32_0 : i32, i32
  }
  func.func @transform_1(%arg0: i32) -> (i32, i32) {
    %c0_i32 = arith.constant 0 : i32
    %c0_i32_0 = arith.constant 0 : i32
    %c0_i32_1 = arith.constant 0 : i32
    return %c0_i32, %c0_i32_0 : i32, i32
  }
  func.func @transform_2(%arg0: i32) -> (i32, i32) {
    %c0_i32 = arith.constant 0 : i32
    %c0_i32_0 = arith.constant 0 : i32
    %c0_i32_1 = arith.constant 0 : i32
    return %c0_i32, %c0_i32_0 : i32, i32
  }
}

</mosaic_0001>

<bundles_post_ra>
// kernel: tpu_custom_call.1
= control target key start
LH: loop header
LB: loop body
LE: loop exit
PB: predicated region body
PF: predicated region fallthrough
CT: control target
= control target key end

     0   :  { %7 = vsyncpa [#allocation3], 0  ;;  %s997_s0 = inlined_call_operand.hbm [shape: f32[16,16], index: 0, kind: input, shape index: {}]   ;;  %s998_s1 = inlined_call_operand.hbm [shape: f32[152,128], index: 1, kind: input, shape index: {}]   ;;  %s999_s2 = inlined_call_operand.hbm [shape: f32[8,128], index: 2, kind: output, shape index: {}]  }
   0x1   :  { %8 = vsyncpa [#allocation6], 0 }
   0x2   :  { %9 = vsyncpa [#allocation4], 0  ;;  %s874_s9 = smov [#allocation2]   ;;  %s802_s13 = scalar_lea.hbm %s997_s0, 256 }
   0x3   :  { %s15_s10 = sshll.u32 %s874_s9, 4  ;;  %p803_p0 = scmp.ne.s32.totalorder %s997_s0, %s802_s13  ;;  %s16_s10 = int_to_ptr.vmem [resolvable:$true] %s15_s10 }
   0x4   :  { %p806_p1 = scmp.lt.u32.totalorder %s802_s13, %s997_s0 }
   0x6   :  { %p808_p2 = pnand %p806_p1, %p803_p0 }
   0x8   :  { %811 = shalt.err (!%p808_p2)
}
   0x9   :  { %s812_s18 = scalar_lea.vmem %s16_s10, 256  ;;  %p817_p4 = scmp.lt.s32.totalorder %s16_s10, %s16_s10 }
   0xa   :  { %p813_p3 = scmp.ne.s32.totalorder %s16_s10, %s812_s18  ;;  %p818_p5 = scmp.lt.s32.totalorder %s812_s18, %s812_s18 }
   0xc   :  { %p819_p6 = por %p818_p5, %p817_p4 }
   0xe   :  { %p820_p7 = pnand %p819_p6, %p813_p3 }
  0x10   :  { %823 = shalt.err (!%p820_p7)
}
  0x11   :  { %s875_s19 = smov 128   ;;  %s876_s20 = smov 8  }
  0x12   :  { %21 = dma.hbm_to_vmem [thread:$0]  %s997_s0, 256, %s16_s10, [#allocation3], %s875_s19, %s875_s19, %s876_s20  }
  0x13   :  { %s877_s23 = smov [#allocation5]   ;;  %s824_s27 = scalar_lea.hbm %s998_s1, 2432 }
  0x14   :  { %s27_s24 = sshll.u32 %s877_s23, 4  ;;  %p825_p8 = scmp.ne.s32.totalorder %s998_s1, %s824_s27  ;;  %s28_s24 = int_to_ptr.vmem [resolvable:$true] %s27_s24 }
  0x15   :  { %p828_p9 = scmp.lt.u32.totalorder %s824_s27, %s998_s1 }
  0x17   :  { %p830_p10 = pnand %p828_p9, %p825_p8 }
  0x19   :  { %833 = shalt.err (!%p830_p10)
}
  0x1a   :  { %s834_s4 = scalar_lea.vmem %s28_s24, 2432  ;;  %p839_p12 = scmp.lt.s32.totalorder %s28_s24, %s28_s24 }
  0x1b   :  { %p835_p11 = scmp.ne.s32.totalorder %s28_s24, %s834_s4  ;;  %p840_p13 = scmp.lt.s32.totalorder %s834_s4, %s834_s4 }
  0x1d   :  { %p841_p0 = por %p840_p13, %p839_p12 }
  0x1f   :  { %p842_p1 = pnand %p841_p0, %p835_p11 }
  0x21   :  { %845 = shalt.err (!%p842_p1)
}
  0x22   :  { %33 = dma.hbm_to_vmem [thread:$0]  %s998_s1, 2432, %s28_s24, [#allocation6], %s875_s19, %s875_s19, %s876_s20  }
  0x23   :  { %868 = dma.done.wait [#allocation3], 256  }
  0x24   :  { %869 = vsyncadd [#allocation3], 4294967040 }
  0x25   :  { %870 = dma.done.wait [#allocation6], 2432  }
  0x26   :  { %871 = vsyncadd [#allocation6], 4294964864  ;;  %vm65_vm0 = vcmask 130048   ;;  %v42_v0 = vld [vmem:[#allocation5] sm:$0xff]  ;;  %v43_v1 = vld [vmem:[#allocation5 + $0x8] sm:$0xff]  ;;  %v61_v11 = vlaneseq  ;;  %vm149_vm1 = vcmask 261120  }
  0x27   :  { %v40_v2 = vld [vmem:[#allocation2] sm:$0xff]  ;;  %v754_v3 = vpack.c.bf16 %v43_v1, %v42_v0  ;;  %v45_v5 = vld [vmem:[#allocation5 + $0x18] sm:$0xff]  ;;  %v46_v8 = vld [vmem:[#allocation5 + $0x20] sm:$0xff]  ;;  %vm246_vm2 = vcmask 1040384   ;;  %s878_s1 = smov 96   ;;  %s879_s6 = smov 127  }
  0x28   :  { %707 = vmatprep.mubr.msk.f32.mxu0 %vm65_vm0, %v40_v2  ;;  %v44_v4 = vld [vmem:[#allocation5 + $0x10] sm:$0xff]  ;;  %v41_v7 = vld [vmem:[#allocation2 + $0x8] sm:$0xff]  ;;  %v47_v9 = vld [vmem:[#allocation5 + $0x28] sm:$0xff]  ;;  %v929_v12 = vshrl.u32 %v61_v11, 7  ;;  %s880_s7 = smov 64   ;;  %vm882_vm3 = vmmov 0  }
  0x29   :  { %v758_v6 = vpack.c.bf16 %v45_v5, %v44_v4  ;;  %755 = vmatprep.subr.bf16.mxu0 %v754_v3  ;;  %v762_v10 = vpack.c.bf16 %v47_v9, %v46_v8  ;;  %v934_v14 = vld [vmem:[#allocation5 + $0x90] sm:$0xff]  ;;  %v49_v30 = vld [vmem:[#allocation5 + $0x38] sm:$0xff]  ;;  %v50_v36 = vld [vmem:[#allocation5 + $0x40] sm:$0xff]  ;;  %s884_s8 = smov 120   ;;  %vm338_vm4 = vcmask 58368   ;;  %vm646_vm5 = vcmask 64512  }
  0x2a   :  { %757 = vmatpush3.bf16.msra.mxu0 %v754_v3  ;;  %v932_v13 = vsub.s32 0, %v929_v12  ;;  %v48_v29 = vld [vmem:[#allocation5 + $0x30] sm:$0xff]  ;;  %v51_v37 = vld [vmem:[#allocation5 + $0x48] sm:$0xff]  ;;  %v254_v46 = vsub.s32 1, %v929_v12  ;;  %v284_v48 = vsub.s32 5, %v929_v12  ;;  %s885_s9 = smov [#allocation7]  }
  0x2b   :  { %759 = vmatprep.subr.bf16.mxu1 %v758_v6  ;;  %v766_v32 = vpack.c.bf16 %v49_v30, %v48_v29  ;;  %v770_v39 = vpack.c.bf16 %v51_v37, %v50_v36  ;;  %v466_v30 = vsub.s32 2, %v929_v12  ;;  %s659_s10 = sshll.u32 %s885_s9, 4  ;;  %vm650_vm6 = vcmask 1041408   ;;  %s660_s10 = int_to_ptr.vmem [resolvable:$true] %s659_s10 }
  0x2c   :  { %761 = vmatpush3.bf16.msra.mxu1 %v758_v6  ;;  %v64_v15 = vrot.slane %v934_v14, %v932_v13  ;;  %v285_v49 = vrot.slane %v934_v14, %v284_v48  ;;  %v269_v50 = vrot.slane %v934_v14, %v254_v46  ;;  %s846_s11 = scalar_lea.vmem %s660_s10, 128  ;;  %p851_p3 = scmp.lt.s32.totalorder %s660_s10, %s660_s10 }
  0x2d   :  { %708 = vmatmul.mubr.msk.f32.vlgmr.msra.gmra.mrb[0].mxu0 %vm65_vm0, %v41_v7  ;;  %763 = vmatprep.subr.bf16.mxu1 %v762_v10  ;;  %p847_p2 = scmp.ne.s32.totalorder %s660_s10, %s846_s11  ;;  %p852_p4 = scmp.lt.s32.totalorder %s846_s11, %s846_s11 }
  0x2e   :  { %767 = vmatprep.subr.bf16.mxu0 %v766_v32 }
  0x2f   :  { %769 = vmatpush3.bf16.msra.mxu0 %v766_v32  ;;  %p853_p5 = por %p852_p4, %p851_p3 }
  0x30   :  { %765 = vmatpush3.bf16.msra.mxu1 %v762_v10  ;;  %771 = vmatprep.subr.bf16.mxu0 %v770_v39 }
  0x31   :  { %p854_p6 = pnand %p853_p5, %p847_p2 }
  0x33   :  { %773 = vmatpush3.bf16.msra.mxu0 %v770_v39 }
 0x100   :  { %v709_v16 = vpop.f32.mrb[0].mxu0 }
 0x101   :  { %v144_v17 = vadd.f32 %v709_v16, %v64_v15  ;;  %v138_v18 = vpop.f32.mrb[1].mxu0 }
 0x102   :  { %v139_v19 = vadd.f32 %v138_v18, %v64_v15  ;;  %v53_v18 = vld [vmem:[#allocation5 + $0x58] sm:$0xff] }
 0x103   :  { %v148_v21 = vmax.f32 %v144_v17, 0.0  ;;  %v52_v17 = vld [vmem:[#allocation5 + $0x50] sm:$0xff] }
 0x104   :  { %v147_v20 = vmax.f32 %v139_v19, 0.0 }
 0x106   :  { %718 = vmatprep.mubr.msk.f32.mxu1 %vm149_vm1, %v147_v20  ;;  %v775_v20 = vpack.c.bf16 %v53_v18, %v52_v17 }
 0x107   :  { %719 = vmatmul.mubr.msk.f32.vlgmr.msra.gmra.mrb[0].mxu1 %vm149_vm1, %v148_v21  ;;  %v881_v21 = vmov 0.0|0.0  }
 0x108   :  { %774 = vmatprep.subr.bf16.mxu1 %v881_v21  ;;  %780 = vmatprep.subr.bf16.mxu0 %v881_v21 }
 0x109   :  { %776 = vmatpush3.bf16.msra.mxu1 %v775_v20 }
 0x10a   :  { %777 = vmatprep.subr.bf16.mxu1 %v881_v21 }
 0x1da   :  { %v940_v22 = vpop.f32.mrb[0].mxu1 }
 0x1db   :  { %v239_v23 = vrot.slane %v940_v22, 4  ;;  %v943_v24 = vpop.f32.mrb[1].mxu1 }
 0x1dc   :  { %v231_v25 = vrot.slane %v943_v24, 4 }
 0x1dd   :  { %v240_v26 = vadd.f32 %v940_v22, %v239_v23  ;;  %v54_v23 = vld [vmem:[#allocation5 + $0x60] sm:$0xff] }
 0x1de   :  { %v232_v27 = vadd.f32 %v231_v25, %v943_v24  ;;  %v55_v25 = vld [vmem:[#allocation5 + $0x68] sm:$0xff] }
 0x1df   :  { %v241_v28 = vrot.slane %v240_v26, 2 }
 0x1e0   :  { %v233_v31 = vrot.slane %v232_v27, 2 }
 0x1e1   :  { %v242_v33 = vadd.f32 %v241_v28, %v240_v26  ;;  %v778_v26 = vpack.c.bf16 %v55_v25, %v54_v23  ;;  %v883_v28 = vmov 0.0  }
 0x1e2   :  { %v234_v34 = vadd.f32 %v233_v31, %v232_v27  ;;  %740 = vmatprep.mubr.msk.f32.mxu1 %vm882_vm3, %v883_v28  ;;  %v467_v31 = vrot.slane %v934_v14, %v466_v30 }
 0x1e3   :  { %v243_v35 = vrot.slane %v242_v33, 1  ;;  %779 = vmatpush3.bf16.msra.mxu1 %v778_v26  ;;  %v567_v26 = vsub.s32 4, %v929_v12 }
 0x1e4   :  { %v235_v38 = vrot.slane %v234_v34, 1 }
 0x1e5   :  { %v244_v40 = vadd.f32 %v243_v35, %v242_v33  ;;  %v56_v33 = vld [vmem:[#allocation5 + $0x70] sm:$0xff] }
 0x1e6   :  { %v236_v41 = vadd.f32 %v235_v38, %v234_v34  ;;  %v57_v34 = vld [vmem:[#allocation5 + $0x78] sm:$0xff] }
 0x1e7   :  { %v245_v42 = vmul.f32 0.125, %v244_v40  ;;  %v781_v36 = vpack.c.bf16 %v57_v34, %v56_v33 }
 0x1e8   :  { %v238_v43 = vmul.f32 0.125, %v236_v41 }
 0x1ea   :  { %v247_v44 = vsel %vm246_vm2, %v238_v43, %v245_v42 }
 0x1eb   :  { %v251_v45 = vrot.slane %v247_v44, %v932_v13  ;;  %v255_v47 = vrot.slane %v247_v44, %v254_v46 }
 0x1ed   :  { %258 = vrot.lane.b32.xlu0 %v251_v45, %s878_s1 }
 0x1f1   :  { %260 = vrot.lane.b32.xlu0 %v255_v47, %s878_s1 }
 0x1f5   :  { %274 = vrot.lane.b32.xlu0 %v251_v45, %s879_s6 }
 0x1f9   :  { %287 = vrot.lane.b32.xlu0 %v285_v49, %s880_s7 }
 0x25f   :  { %v259_v51 = vpop.permute.xlu0 %258 }
 0x260   :  { %v264_v52 = vadd.f32 %v259_v51, %v943_v24 }
 0x262   :  { %v270_v53 = vadd.f32 %v269_v50, %v264_v52 }
 0x263   :  { %v261_v54 = vpop.permute.xlu0 %260 }
 0x264   :  { %v272_v55 = vmax.f32 %v270_v53, 0.0  ;;  %v265_v56 = vadd.f32 %v940_v22, %v261_v54 }
 0x266   :  { %v271_v57 = vadd.f32 %v269_v50, %v265_v56  ;;  %729 = vmatprep.mubr.msk.f32.mxu0 %vm149_vm1, %v272_v55 }
 0x267   :  { %v275_v16 = vpop.permute.xlu0 %274 }
 0x268   :  { %v273_v58 = vmax.f32 %v271_v57, 0.0 }
 0x26a   :  { %730 = vmatmul.mubr.msk.f32.vlgmr.msra.gmra.mrb[2].mxu0 %vm149_vm1, %v273_v58 }
 0x26b   :  { %v288_v27 = vpop.permute.xlu0 %287  ;;  %751 = vmatprep.mubr.msk.f32.mxu0 %vm882_vm3, %v883_v28  ;;  %782 = vmatpush3.bf16.msra.mxu0 %v781_v36 }
 0x26c   :  { %783 = vmatprep.subr.bf16.mxu0 %v881_v21 }
 0x33d   :  { %v731_v59 = vpop.f32.mrb[2].mxu0 }
 0x33e   :  { %v438_v60 = vrot.slane %v731_v59, 4  ;;  %v422_v61 = vpop.f32.mrb[3].mxu0 }
 0x33f   :  { %v431_v62 = vrot.slane %v422_v61, 4 }
 0x340   :  { %v439_v63 = vadd.f32 %v731_v59, %v438_v60  ;;  %v58_v60 = vld [vmem:[#allocation5 + $0x80] sm:$0xff] }
 0x341   :  { %v432_v0 = vadd.f32 %v431_v62, %v422_v61 }
 0x342   :  { %v440_v1 = vrot.slane %v439_v63, 2 }
 0x343   :  { %v433_v2 = vrot.slane %v432_v0, 2 }
 0x344   :  { %v441_v3 = vadd.f32 %v440_v1, %v439_v63 }
 0x345   :  { %v434_v4 = vadd.f32 %v433_v2, %v432_v0  ;;  %v489_v0 = vsub.s32 3, %v929_v12 }
 0x346   :  { %v442_v5 = vrot.slane %v441_v3, 1 }
 0x347   :  { %v435_v6 = vrot.slane %v434_v4, 1  ;;  %v490_v1 = vrot.slane %v934_v14, %v489_v0 }
 0x348   :  { %v443_v7 = vadd.f32 %v442_v5, %v441_v3 }
 0x349   :  { %v436_v8 = vadd.f32 %v435_v6, %v434_v4 }
 0x34a   :  { %v444_v9 = vmul.f32 0.125, %v443_v7 }
 0x34b   :  { %v437_v10 = vmul.f32 0.125, %v436_v8 }
 0x34d   :  { %v445_v11 = vsel %vm246_vm2, %v437_v10, %v444_v9 }
 0x34e   :  { %v449_v15 = vrot.slane %v445_v11, %v932_v13  ;;  %v453_v19 = vrot.slane %v445_v11, %v254_v46  ;;  %v280_v13 = vadd.f32 %v275_v16, %v943_v24 }
 0x350   :  { %456 = vrot.lane.b32.xlu1 %v449_v15, %s878_s1  ;;  %v290_v29 = vadd.f32 %v288_v27, %v280_v13 }
 0x354   :  { %458 = vrot.lane.b32.xlu1 %v453_v19, %s878_s1 }
 0x358   :  { %276 = vrot.lane.b32.xlu1 %v255_v47, %s879_s6 }
 0x35c   :  { %294 = vrot.lane.b32.xlu1 %v290_v29, %s880_s7 }
 0x3c2   :  { %v457_v32 = vpop.permute.xlu1 %456 }
 0x3c3   :  { %v462_v35 = vadd.f32 %v457_v32, %v422_v61  ;;  %v59_v61 = vld [vmem:[#allocation5 + $0x88] sm:$0xff] }
 0x3c4   :  { %v784_v62 = vpack.c.bf16 %v59_v61, %v58_v60 }
 0x3c5   :  { %v468_v24 = vadd.f32 %v467_v31, %v462_v35 }
 0x3c6   :  { %v459_v37 = vpop.permute.xlu1 %458  ;;  %785 = vmatpush3.bf16.msra.mxu0 %v784_v62 }
 0x3c7   :  { %v470_v38 = vmax.f32 %v468_v24, 0.0  ;;  %v463_v39 = vadd.f32 %v731_v59, %v459_v37 }
 0x3c9   :  { %v472_v40 = vsel %vm149_vm1, %v470_v38, 0.0  ;;  %v469_v41 = vadd.f32 %v467_v31, %v463_v39 }
 0x3ca   :  { %v473_v42 = vrot.slane %v472_v40, 4  ;;  %v277_v43 = vpop.permute.xlu1 %276 }
 0x3cb   :  { %v471_v44 = vmax.f32 %v469_v41, 0.0  ;;  %v281_v45 = vadd.f32 %v940_v22, %v277_v43 }
 0x3cc   :  { %v474_v46 = vadd.f32 %v473_v42, %v472_v40 }
 0x3cd   :  { %v479_v47 = vsel %vm149_vm1, %v471_v44, 0.0  ;;  %v291_v48 = vadd.f32 %v288_v27, %v281_v45  ;;  %v568_v27 = vrot.slane %v934_v14, %v567_v26 }
 0x3ce   :  { %v475_v49 = vrot.slane %v474_v46, 2  ;;  %v480_v50 = vrot.slane %v479_v47, 4  ;;  %v295_v51 = vpop.permute.xlu1 %294 }
 0x3cf   :  { %296 = vrot.lane.b32.xlu0 %v291_v48, %s880_s7  ;;  %300 = vxpose.xlu1.b32.start [1/2] (short) (narrow) %v295_v51, 8 }
 0x3d0   :  { %v476_v52 = vadd.f32 %v475_v49, %v474_v46  ;;  %v481_v53 = vadd.f32 %v480_v50, %v479_v47 }
 0x3d2   :  { %v482_v54 = vrot.slane %v481_v53, 2  ;;  %v477_v55 = vrot.slane %v476_v52, 1 }
 0x3d4   :  { %v483_v56 = vadd.f32 %v482_v54, %v481_v53  ;;  %v478_v58 = vadd.f32 %v477_v55, %v476_v52 }
 0x3d6   :  { %v484_v57 = vrot.slane %v483_v56, 1 }
 0x3d8   :  { %v485_v59 = vadd.f32 %v484_v57, %v483_v56 }
 0x3da   :  { %v486_v22 = vsel %vm246_vm2, %v478_v58, %v485_v59 }
 0x3db   :  { %741 = vmatmul.mubr.msk.f32.vlgmr.msra.gmra.mrb[2].mxu1 %vm149_vm1, %v486_v22 }
 0x441   :  { %v297_v63 = vpop.permute.xlu0 %296 }
 0x442   :  { %301 = vxpose.xlu1.b32.end [2/2] (short) (narrow) %v297_v63, 8 }
 0x4ae   :  { %v560_v2 = vpop.f32.mrb[2].mxu1 }
 0x4af   :  { %v561_v3 = vadd.f32 %v560_v2, %v490_v1  ;;  %v742_v4 = vpop.f32.mrb[3].mxu1 }
 0x4b1   :  { %v564_v5 = vmax.f32 %v561_v3, 0.0 }
 0x4b3   :  { %752 = vmatmul.mubr.msk.f32.vlgmr.msra.gmra.mrb[4].mxu0 %vm149_vm1, %v564_v5 }
 0x4be   :  { %v316_v6 = vpop.trf.xlu1 }
 0x4bf   :  { %v333_v7 = vrot.slane %v316_v6, 7 }
 0x4c1   :  { %334 = vrot.lane.b32.xlu0 %v333_v7, %s884_s8 }
 0x533   :  { %v335_v8 = vpop.permute.xlu0 %334 }
 0x534   :  { %v337_v9 = vsel %vm246_vm2, %v316_v6, %v335_v8 }
 0x535   :  { %v339_v10 = vsel %vm338_vm4, %v337_v9, -inf }
 0x536   :  { %340 = vmax.xlane.f32.xlu0 %v339_v10 }
 0x586   :  { %v638_v11 = vpop.f32.mrb[4].mxu0 }
 0x587   :  { %v753_v15 = vpop.f32.mrb[5].mxu0  ;;  %v639_v28 = vadd.f32 %v638_v11, %v568_v27 }
 0x5c3   :  { %v341_v16 = vpop.xlane.xlu0 %340 }
 0x5c4   :  { %v342_v17 = vsub.f32 %v337_v9, %v341_v16 }
 0x5c6   :  { %v343_v18 = vmul.f32 1.442695, %v342_v17 }
 0x5c8   :  { %798 = vpow2.f32 %v343_v18 }
 0x5d2   :  { %v799_v19 = vpop.eup %798 }
 0x5d3   :  { %v345_v20 = vsel %vm338_vm4, %v799_v19, 0.0 }
 0x5d4   :  { %346 = vadd.xlane.f32.xlu0 %v345_v20 }
 0x661   :  { %v347_v21 = vpop.xlane.xlu0 %346 }
 0x662   :  { %800 = vrcp.f32 %v347_v21 }
 0x66c   :  { %v801_v23 = vpop.eup %800 }
 0x66d   :  { %v349_v25 = vmul.f32 %v801_v23, %v799_v19 }
 0x66f   :  { %643 = vrot.lane.b32.xlu0 %v349_v25, %s876_s20 }
 0x6e1   :  { %v644_v13 = vpop.permute.xlu0 %643 }
 0x6e2   :  { %v647_v29 = vsel %vm646_vm5, 0.0, %v644_v13 }
 0x6e3   :  { %v648_v30 = vsel %vm65_vm0, %v647_v29, 0.0 }
 0x6e4   :  { %v649_v31 = vadd.f32 %v648_v30, %v639_v28 }
 0x6e6   :  { %v651_v32 = vsel %vm650_vm6, %v649_v31, 0.0 }
 0x6e7   :  { %652 = vst [vmem:[#allocation7] sm:$0xff] %v651_v32 }
 0x6e8   :  { %857 = shalt.err (!%p854_p6)
}
 0x6e9   :  { %s858_s14 = scalar_lea.hbm %s999_s2, 128 }
 0x6ea   :  { %p859_p7 = scmp.ne.s32.totalorder %s999_s2, %s858_s14  ;;  %p862_p8 = scmp.lt.u32.totalorder %s858_s14, %s999_s2 }
 0x6ec   :  { %p864_p9 = pnand %p862_p8, %p859_p7 }
 0x6ee   :  { %867 = shalt.err (!%p864_p9)
}
 0x6ef   :  { %662 = dma.vmem_to_hbm [thread:$0]  %s660_s10, 128, %s999_s2, [#allocation4]  }
 0x6f0   :  { %872 = dma.done.wait [#allocation4], 128  }
 0x6f1   :  { %873 = vsyncadd [#allocation4], 4294967168 }
 0x6f2   :  { %666 = vsyncpa [#allocation3], 1 }
 0x6f3   :  { %667 = vsyncpa [#allocation6], 1 }
 0x6f4   :  { %668 = vsyncpa [#allocation4], 1 }

</bundles_post_ra>
